<compile_context>
chip_gen: v7x
topology: tpu7x:2x2x1
jax: 0.10.0
libtpu: 0.0.40
codegen_flags: <defaults>
</compile_context>

<pallas_src>
import math

import jax
import jax.numpy as jnp
from jax.experimental import pallas as pl
from jax.experimental.pallas import tpu as pltpu


# ----------------------------------------------------------------------------
# Pallas kernel: fused  out = x + pe  (broadcast over batch), dropout = identity
# ----------------------------------------------------------------------------

def _pos_encoding_kernel(x_ref, pe_ref, o_ref):
    """x_ref: [TL, B, D]; pe_ref: [TL, D]; o_ref: [TL, B, D]."""
    # Batch (sublane) broadcast of pe happens in VMEM; the VPU/XLU work is
    # free filler since this kernel is HBM-bandwidth bound.
    o_ref[...] = x_ref[...] + pe_ref[...][:, None, :]
    # TODO(synk): training-mode dropout (p=0.1) would need pltpu.prng_seed +
    # pltpu.stateful_bernoulli masking and 1/(1-p) scaling; eval mode is an
    # identity, which is what this forward implements.


# ----------------------------------------------------------------------------
# Tiling heuristic
# ----------------------------------------------------------------------------

def _pick_seq_tile(L, target=512):
    """Largest sequence tile <= target, multiple of 8 (sublane alignment for
    the 2-D pe block), capped to roughly L/4 so the grid keeps several steps
    (feeds both v7x TensorCores and the DMA/compute pipeline)."""
    tile = min(target, max(8, -(-L // 4)))
    tile = max(8, (tile // 8) * 8)
    return tile


# ----------------------------------------------------------------------------
# Wrapper
# ----------------------------------------------------------------------------

def positional_encoding_forward(x, pe, *, seq_tile=None):
    """Eval-mode forward of PositionalEncoding:  out = x + pe[:L].

    x : [L, B, D]     (seq_len, batch, embed dim)
    pe: [max_len, D]  precomputed sin/cos table (init-time buffer)
    """
    L, B, D = x.shape
    max_len, d_model = pe.shape
    assert d_model == D, f"pe embed dim {d_model} != x embed dim {D}"
    assert L <= max_len, f"sequence length {L} exceeds pe max_len {max_len}"

    pe = pe.astype(x.dtype)  # keep table in activation dtype (no wasted BW)

    if seq_tile is None:
        seq_tile = _pick_seq_tile(L)
    grid = (pl.cdiv(L, seq_tile),)  # ragged final block is masked by Pallas

    itemsize = jnp.dtype(x.dtype).itemsize
    cost = pl.CostEstimate(
        flops=L * B * D,
        transcendentals=0,
        bytes_accessed=2 * L * B * D * itemsize + L * D * itemsize,
    )

    # Double-buffered live blocks: x + out ( seq_tile*B*D each ) + pe (seq_tile*D).
    block_bytes = (2 * seq_tile * B * D + seq_tile * D) * itemsize
    vmem_limit = min(max(16 << 20, 2 * block_bytes + (4 << 20)), 100 << 20)

    return pl.pallas_call(
        _pos_encoding_kernel,
        out_shape=jax.ShapeDtypeStruct((L, B, D), x.dtype),
        grid=grid,
        in_specs=[
            pl.BlockSpec((seq_tile, B, D), lambda i: (i, 0, 0)),
            pl.BlockSpec((seq_tile, D), lambda i: (i, 0)),  # 2-D pe: no sublane pad
        ],
        out_specs=pl.BlockSpec((seq_tile, B, D), lambda i: (i, 0, 0)),
        compiler_params=pltpu.CompilerParams(
            dimension_semantics=("parallel",),
            vmem_limit_bytes=vmem_limit,
        ),
        cost_estimate=cost,
    )(x, pe)


# ----------------------------------------------------------------------------
# __init__-time buffer construction (matches the PyTorch register_buffer code;
# kept 2-D [max_len, d_model] -- the unsqueeze/transpose in PyTorch is layout
# plumbing only)
# ----------------------------------------------------------------------------

def make_positional_encoding(d_model, max_len=5000, dtype=jnp.float32):
    position = jnp.arange(max_len, dtype=jnp.float32)[:, None]          # [max_len, 1]
    div_term = jnp.exp(jnp.arange(0, d_model, 2, dtype=jnp.float32)
                       * (-math.log(10000.0) / d_model))                # [d_model/2]
    angles = position * div_term                                        # [max_len, d_model/2]
    pe = jnp.zeros((max_len, d_model), dtype=jnp.float32)
    pe = pe.at[:, 0::2].set(jnp.sin(angles))
    pe = pe.at[:, 1::2].set(jnp.cos(angles))
    return pe.astype(dtype)                                             # [max_len, d_model]


# ----------------------------------------------------------------------------
# Main
# ----------------------------------------------------------------------------

if __name__ == "__main__":
    L, B, D = 32, 8, 128          # seq_len, batch, embed dim (lane-dense D)
    MAX_LEN = 128

    key = jax.random.PRNGKey(0)
    k0, k1 = jax.random.split(key)
    x = jax.random.normal(k0, (L, B, D), jnp.float32)

    pe = make_positional_encoding(D, max_len=MAX_LEN)     # [MAX_LEN, D]

    out = positional_encoding_forward(x, pe)
    jax.block_until_ready(out)

    # Pure-JAX reference (eval mode: dropout is identity).
    ref = x + pe[:L][:, None, :]
    assert out.shape == (L, B, D)
    assert bool(jnp.all(jnp.isfinite(out)))
    assert bool(jnp.allclose(out, ref, atol=1e-6, rtol=1e-6))

    # Ragged sequence length (not a multiple of the tile): exercises the
    # masked final block that replaced the old single-block fallback.
    L2 = 20
    x2 = jax.random.normal(k1, (L2, B, D), jnp.float32)
    out2 = positional_encoding_forward(x2, pe, seq_tile=8)
    jax.block_until_ready(out2)
    ref2 = x2 + pe[:L2][:, None, :]
    assert out2.shape == (L2, B, D)
    assert bool(jnp.allclose(out2, ref2, atol=1e-6, rtol=1e-6))

    print("KERNEL_OK")
</pallas_src>

<mosaic_0001>
module attributes {stable_mosaic.version = 11 : i64} {
  func.func @_pos_encoding_kernel(%arg0: i32, %arg1: memref<8x8x128xf32, #tpu.memory_space<vmem>>, %arg2: memref<8x128xf32, #tpu.memory_space<vmem>>, %arg3: memref<8x8x128xf32, #tpu.memory_space<vmem>>) attributes {dimension_semantics = [#tpu.dimension_semantics<parallel>], iteration_bounds = array<i64: 4>, scalar_prefetch = 0 : i64, scratch_operands = 0 : i64, tpu.core_type = #tpu.core_type<tc>, window_params = [{transform_indices = @transform_0, window_bounds = array<i64: 8, 8, 128>}, {transform_indices = @transform_1, window_bounds = array<i64: 8, 128>}, {transform_indices = @transform_2, window_bounds = array<i64: 8, 8, 128>}]} {
    %c0 = arith.constant 0 : index
    %c0_0 = arith.constant 0 : index
    %c0_1 = arith.constant 0 : index
    %0 = vector.load %arg1[%c0, %c0_0, %c0_1] : memref<8x8x128xf32, #tpu.memory_space<vmem>>, vector<8x8x128xf32>
    %c0_2 = arith.constant 0 : index
    %c0_3 = arith.constant 0 : index
    %1 = vector.load %arg2[%c0_2, %c0_3] : memref<8x128xf32, #tpu.memory_space<vmem>>, vector<8x128xf32>
    %2 = vector.shape_cast %1 : vector<8x128xf32> to vector<8x1x128xf32>
    %3 = vector.broadcast %2 : vector<8x1x128xf32> to vector<8x8x128xf32>
    %4 = arith.addf %0, %3 : vector<8x8x128xf32>
    %c0_4 = arith.constant 0 : index
    %c0_5 = arith.constant 0 : index
    %c0_6 = arith.constant 0 : index
    %5 = vector.load %arg3[%c0_4, %c0_5, %c0_6] : memref<8x8x128xf32, #tpu.memory_space<vmem>>, vector<8x8x128xf32>
    tpu.vector_store %arg3[%c0_4, %c0_5, %c0_6], %4 {strides = array<i32>} : memref<8x8x128xf32, #tpu.memory_space<vmem>>, vector<8x8x128xf32>,
    return
  }
  func.func @transform_0(%arg0: i32) -> (i32, i32, i32) {
    %c0_i32 = arith.constant 0 : i32
    %c0_i32_0 = arith.constant 0 : i32
    %c0_i32_1 = arith.constant 0 : i32
    return %arg0, %c0_i32, %c0_i32_0 : i32, i32, i32
  }
  func.func @transform_1(%arg0: i32) -> (i32, i32) {
    %c0_i32 = arith.constant 0 : i32
    %c0_i32_0 = arith.constant 0 : i32
    return %arg0, %c0_i32 : i32, i32
  }
  func.func @transform_2(%arg0: i32) -> (i32, i32, i32) {
    %c0_i32 = arith.constant 0 : i32
    %c0_i32_0 = arith.constant 0 : i32
    %c0_i32_1 = arith.constant 0 : i32
    return %arg0, %c0_i32, %c0_i32_0 : i32, i32, i32
  }
}

</mosaic_0001>

<bundles_post_ra>
// kernel: tpu_custom_call.1
= control target key start
LH: loop header
LB: loop body
LE: loop exit
PB: predicated region body
PF: predicated region fallthrough
CT: control target
= control target key end

     0   :  { %7 = vsyncpa [#allocation3], 0  ;;  %s873_s0 = inlined_call_operand.hbm [shape: f32[32,8,128], index: 0, kind: input, shape index: {}]   ;;  %s874_s1 = inlined_call_operand.hbm [shape: f32[128,128], index: 1, kind: input, shape index: {}]   ;;  %s875_s2 = inlined_call_operand.hbm [shape: f32[32,8,128], index: 2, kind: output, shape index: {}]  }
   0x1   :  { %9 = vsyncpa [#allocation3 + $0x1], 0 }
   0x2   :  { %10 = vsyncpa [#allocation6], 0 }
   0x3   :  { %12 = vsyncpa [#allocation6 + $0x1], 0 }
   0x4   :  { %13 = vsyncpa [#allocation4], 0 }
   0x5   :  { %15 = vsyncpa [#allocation4 + $0x1], 0  ;;  %s657_s9 = smov 0   ;;  %s659_s10 = smov 0  }
   0x6   :  { %s661_s11 = smov 0   ;;  %s663_s12 = smov 0  }
   0x7 LB: > { %s678_s13 = sadd.s32 4294967295, %s632_s12   ;;  %s426_s14 = sadd.s32 4294967294, %s632_s12   ;;  %s632_s12 = sphi %s663_s12, %s891_s12   ;;  %s628_s11 = sphi %s661_s11, %s890_s11   ;;  %s624_s10 = sphi %s659_s10, %s889_s10   ;;  %s620_s9 = sphi %s657_s9, %s888_s9  }
   0x8   : > { %s682_s15 = sadd.s32 1, %s632_s12   ;;  %s28_s16 = sadd.s32 1, %s628_s11 }
   0x9   : > { %s25_s17 = ssub.s32 %s632_s12, %s682_s15  ;;  %p35_p0 = scmp.ne.s32.totalorder %s628_s11, %s624_s10 }
   0xa   : > { %p26_p1 = scmp.eq.s32.totalorder %s25_s17, 0  ;;  %p36_p2 = scmp.eq.s32.totalorder %s632_s12, 0 }
   0xb   : > { %p41_p3 = scmp.ne.s32.totalorder %s624_s10, %s620_s9  ;;  %p42_p4 = scmp.eq.s32.totalorder %s678_s13, 0 }
   0xc   : > { %s694_s18 = scalar_select %p26_p1, %s628_s11, %s28_s16  }
   0xd   : > { %p696_p5 = por %p36_p2, %p35_p0  ;;  %p700_p6 = por %p42_p4, %p41_p3 }
   0xe   : > { %p91_p7 = scmp.eq.s32.totalorder %s678_s13, 3  ;;  %p97_p8 = scmp.eq.s32.totalorder %s426_s14, 3 }
   0xf   : > { %s879_s20 = scalar_select %p700_p6, 1, 0 }
  0x10   : > { %p462_p9 = scmp.lt.s32.totalorder %s632_s12, 4  ;;  %p706_p10 = por %p91_p7, %p35_p0 }
  0x11   : > { %p710_p11 = por %p97_p8, %p41_p3  ;;  %s715_s23 = sand.u32 1, %s628_s11  }
  0x12   : > { %s880_s21 = scalar_select %p706_p10, 1, 0 }
  0x13   : > { %s881_s22 = scalar_select %p710_p11, 1, 0 }
  0x14   : > { %s443_s24 = sshll.u32 %s632_s12, 10  ;;  %s429_s25 = sshll.u32 %s715_s23, 6 }
  0x15   : > { %s722_s28 = scalar_lea.hbm %s873_s0, %s443_s24  ;;  %s121_s29 = scalar_lea.vmem [#allocation2], %s429_s25 }
  0x16   : > { %s128_s30 = sshll.u32 %s121_s29, 4  ;;  %p726_p12 = pnand %p462_p9, %p696_p5  ;;  %s730_s30 = int_to_ptr.vmem [resolvable:$true] %s128_s30 }
  0x17   : > { %s118_s4 = scalar_lea.sflag [#allocation3], %s715_s23  ;;  %s502_s5 = scalar_lea.hbm %s722_s28, 1024 }
  0x18   : > { %p503_p13 = scmp.ne.s32.totalorder %s722_s28, %s502_s5  ;;  %p504_p0 = pneg %p726_p12 }
  0x19   : > { %s507_s8 = scalar_lea.hbm %s873_s0, 4096  ;;  %p508_p3 = scmp.lt.u32.totalorder %s722_s28, %s873_s0 }
  0x1a   : > { %p505_p1 = pnand %p504_p0, %p503_p13  ;;  %p509_p4 = scmp.lt.u32.totalorder %s507_s8, %s502_s5 }
  0x1b   : > { %p511_p7 = scmp.lt.u32.totalorder %s502_s5, %s722_s28 }
  0x1c   : > { %p506_p2 = pneg %p505_p1  ;;  %p510_p5 = por %p509_p4, %p508_p3 }
  0x1e   : > { %p512_p8 = por %p511_p7, %p510_p5 }
  0x20   : > { %p513_p9 = pnand %p512_p8, %p506_p2 }
  0x22   : > { %516 = shalt.err (!%p513_p9)
}
  0x23   : > { %s517_s17 = scalar_lea.vmem %s730_s30, 1024  ;;  %s634_s19 = smov [#allocation2]  }
  0x24   : > { %p518_p13 = scmp.ne.s32.totalorder %s730_s30, %s517_s17  ;;  %s522_s24 = sshll.u32 %s634_s19, 4  ;;  %s523_s24 = int_to_ptr.vmem [resolvable:$false] %s522_s24 }
  0x25   : > { %s524_s25 = scalar_lea.vmem %s523_s24, 2048  ;;  %p525_p10 = scmp.lt.s32.totalorder %s730_s30, %s523_s24 }
  0x26   : > { %p520_p1 = pnand %p518_p13, %p504_p0  ;;  %p526_p3 = scmp.lt.s32.totalorder %s524_s25, %s517_s17 }
  0x28   : > { %p521_p11 = pneg %p520_p1  ;;  %p527_p4 = por %p526_p3, %p525_p10 }
  0x2a   : > { %p528_p5 = pnand %p527_p4, %p521_p11 }
  0x2c   : > { %531 = shalt.err (!%p528_p5)
}
  0x2d   : > { %s635_s26 = smov 128   ;;  %s636_s27 = smov 8  }
  0x2e   : > { %454 = dma.hbm_to_vmem [thread:$0]  (!%p726_p12), %s722_s28, 1024, %s730_s30, %s118_s4, %s635_s26, %s635_s26, %s636_s27  }
  0x2f   : > { %p434_p2 = scmp.ge.s32.totalorder %s632_s12, 1  ;;  %p154_p7 = scmp.lt.s32.totalorder %s632_s12, 5 }
  0x30   : > { %s432_s29 = sshll.u32 %s715_s23, 3  ;;  %s433_s6 = sshll.u32 %s632_s12, 7 }
  0x31   : > { %p763_p10 = pnand %p434_p2, %p154_p7  ;;  %s142_s7 = scalar_lea.vmem [#allocation5], %s432_s29 }
  0x32   : > { %s149_s8 = sshll.u32 %s142_s7, 4  ;;  %s771_s17 = scalar_lea.hbm %s874_s1, %s433_s6  ;;  %s150_s8 = int_to_ptr.vmem [resolvable:$true] %s149_s8 }
  0x33   : > { %s883_s5 = scalar_select %p763_p10, 1, 0 }
  0x34   : > { %s139_s28 = scalar_lea.sflag [#allocation6], %s715_s23  ;;  %s532_s30 = scalar_lea.hbm %s771_s17, 128 }
  0x35   : > { %p533_p11 = scmp.ne.s32.totalorder %s771_s17, %s532_s30  ;;  %s537_s24 = scalar_lea.hbm %s874_s1, 2048 }
  0x36   : > { %p538_p13 = scmp.lt.u32.totalorder %s771_s17, %s874_s1  ;;  %p539_p1 = scmp.lt.u32.totalorder %s537_s24, %s532_s30 }
  0x37   : > { %p535_p8 = pnand %p533_p11, %p504_p0  ;;  %p541_p4 = scmp.lt.u32.totalorder %s532_s30, %s771_s17 }
  0x38   : > { %p540_p3 = por %p539_p1, %p538_p13 }
  0x39   : > { %p536_p9 = pneg %p535_p8 }
  0x3a   : > { %p542_p5 = por %p541_p4, %p540_p3 }
  0x3c   : > { %p543_p2 = pnand %p542_p5, %p536_p9 }
  0x3e   : > { %546 = shalt.err (!%p543_p2)
}
  0x3f   : > { %s547_s23 = scalar_lea.vmem %s150_s8, 128  ;;  %s637_s27 = smov [#allocation5]  }
  0x40   : > { %p548_p7 = scmp.ne.s32.totalorder %s150_s8, %s547_s23  ;;  %s552_s29 = sshll.u32 %s637_s27, 4  ;;  %s553_s29 = int_to_ptr.vmem [resolvable:$false] %s552_s29 }
  0x41   : > { %s554_s6 = scalar_lea.vmem %s553_s29, 256  ;;  %p555_p6 = scmp.lt.s32.totalorder %s150_s8, %s553_s29 }
  0x42   : > { %p550_p11 = pnand %p548_p7, %p504_p0  ;;  %p556_p10 = scmp.lt.s32.totalorder %s554_s6, %s547_s23 }
  0x44   : > { %p551_p8 = pneg %p550_p11  ;;  %p557_p1 = por %p556_p10, %p555_p6 }
  0x46   : > { %p558_p13 = pnand %p557_p1, %p551_p8 }
  0x48   : > { %561 = shalt.err (!%p558_p13)
}
  0x49   : > { %457 = dma.hbm_to_vmem [thread:$0]  (!%p726_p12), %s771_s17, 128, %s150_s8, %s139_s28  }
  0x4a   : > { %p884_p9 = scmp.ne.s32.totalorder %s883_s5, 0 }
  0x4b   : > { %s796_s7 = sand.u32 (!%p884_p9), 1, %s624_s10   ;;  %p885_p6 = scmp.ne.s32.totalorder (!%p884_p9), %s879_s20, 0 }
  0x4c   : > { %158 = sbr.rel (%p884_p9) target bundleno = 122 (0x7a), region = 28  ;;  %s435_s14 = sshll.u32 (!%p884_p9), %s796_s7, 6 }
  0x4d   : > { %s161_s16 = scalar_lea.sflag (!%p884_p9), [#allocation3], %s796_s7  ;;  %s802_s30 = scalar_lea.vmem (!%p884_p9), [#allocation2], %s435_s14 }
  0x53   : > { %607 = dma.done.wait (%p885_p6), %s161_s16, 1024  }
  0x54   : > { %609 = vsyncadd (%p885_p6), %s161_s16, 4294966272  ;;  %s436_s3 = sshll.u32 %s796_s7, 3  ;;  %s170_s5 = scalar_lea.sflag [#allocation6], %s796_s7 }
  0x55   : > { %s173_s8 = scalar_lea.vmem [#allocation5], %s436_s3 }
  0x56   : > { %611 = dma.done.wait (%p885_p6), %s170_s5, 128  }
  0x57   : > { %613 = vsyncadd (%p885_p6), %s170_s5, 4294967168  ;;  %v215_v0 = vlaneseq  ;;  %v638_v1 = vmov 1966171168   ;;  %v209_v6 = vld [vmem:[%s173_s8] sm:$0xff]  ;;  %v203_v19 = vld [vmem:[%s802_s30 + $0x10] sm:$0xff]  ;;  %s198_s20 = scalar_lea.vmem [#allocation7], %s435_s14 }
  0x58   : > { %v213_v2 = vunpack.c.l.s4 %v638_v1  ;;  %v211_v9 = vcombine.high %v209_v6, %v209_v6  ;;  %v201_v13 = vld [vmem:[%s802_s30] sm:$0xff]  ;;  %v202_v18 = vld [vmem:[%s802_s30 + $0x8] sm:$0xff]  ;;  %v204_v26 = vld [vmem:[%s802_s30 + $0x18] sm:$0xff]  ;;  %s330_s17 = sshll.u32 %s198_s20, 4  ;;  %s444_s28 = sshll.u32 %s678_s13, 10  ;;  %s825_s17 = int_to_ptr.vmem [resolvable:$true] %s330_s17 }
  0x59   : > { %v216_v3 = vshrl.u32 %v215_v0, 7  ;;  %v205_v25 = vld [vmem:[%s802_s30 + $0x20] sm:$0xff]  ;;  %v206_v33 = vld [vmem:[%s802_s30 + $0x28] sm:$0xff]  ;;  %v207_v34 = vld [vmem:[%s802_s30 + $0x30] sm:$0xff]  ;;  %s830_s13 = scalar_lea.hbm %s875_s2, %s444_s28  ;;  %s317_s24 = scalar_lea.sflag [#allocation4], %s796_s7 }
  0x5a   : > { %v214_v4 = vunpack.c.0.s8 %v213_v2  ;;  %v208_v40 = vld [vmem:[%s802_s30 + $0x38] sm:$0xff]  ;;  %s562_s25 = scalar_lea.vmem %s825_s17, 1024  ;;  %p886_p0 = scmp.ne.s32.totalorder %s880_s21, 0 }
  0x5b   : > { %v262_v8 = vsub.s32 0, %v216_v3  ;;  %p563_p12 = scmp.ne.s32.totalorder %s825_s17, %s562_s25  ;;  %s639_s26 = smov [#allocation7]  }
  0x5c   : > { %v217_v5 = vsub.s32 %v214_v4, %v216_v3  ;;  %s566_s23 = sshll.u32 %s639_s26, 4  ;;  %s567_s23 = int_to_ptr.vmem [resolvable:$false] %s566_s23 }
  0x5d   : > { %p564_p10 = pnand %p563_p12, %p886_p0  ;;  %s568_s27 = scalar_lea.vmem %s567_s23, 2048 }
  0x5e   : > { %v218_v7 = vrot.slane %v209_v6, %v217_v5  ;;  %v225_v12 = vrot.slane %v211_v9, %v217_v5  ;;  %p569_p4 = scmp.lt.s32.totalorder %s825_s17, %s567_s23  ;;  %p570_p5 = scmp.lt.s32.totalorder %s568_s27, %s562_s25 }
  0x5f   : > { %p565_p3 = pneg %p564_p10 }
  0x60   : > { %v234_v10 = vrot.slane %v218_v7, %v217_v5  ;;  %v226_v11 = vcombine.high %v218_v7, %v218_v7  ;;  %v241_v17 = vrot.slane %v225_v12, %v217_v5  ;;  %v227_v20 = vcombine.high %v225_v12, %v225_v12  ;;  %p571_p2 = por %p570_p5, %p569_p4 }
  0x62   : > { %v263_v14 = vrot.slane %v234_v10, %v262_v8  ;;  %v248_v15 = vrot.slane %v226_v11, %v217_v5  ;;  %v256_v16 = vcombine.high %v234_v10, %v234_v10  ;;  %v279_v27 = vrot.slane %v241_v17, %v262_v8  ;;  %p572_p7 = pnand %p571_p2, %p565_p3 }
  0x63   : > { %v255_v28 = vrot.slane %v227_v20, %v217_v5  ;;  %v257_v29 = vcombine.high %v241_v17, %v241_v17 }
  0x64   : > { %v300_v21 = vadd.f32 %v263_v14, %v201_v13  ;;  %v267_v22 = vrot.slane %v248_v15, %v262_v8  ;;  %v271_v23 = vrot.slane %v256_v16, %v262_v8  ;;  %v258_v24 = vcombine.high %v248_v15, %v248_v15 }
  0x65   : > { %v304_v35 = vadd.f32 %v279_v27, %v205_v25  ;;  %v283_v36 = vrot.slane %v255_v28, %v262_v8  ;;  %v287_v37 = vrot.slane %v257_v29, %v262_v8  ;;  %v259_v38 = vcombine.high %v255_v28, %v255_v28 }
  0x66   : > { %308 = vst [vmem:[%s198_s20] sm:$0xff] %v300_v21  ;;  %v301_v30 = vadd.f32 %v267_v22, %v202_v18  ;;  %v302_v31 = vadd.f32 %v271_v23, %v203_v19  ;;  %v275_v32 = vrot.slane %v258_v24, %v262_v8 }
  0x67   : > { %312 = vst [vmem:[%s198_s20 + $0x20] sm:$0xff] %v304_v35  ;;  %v305_v41 = vadd.f32 %v283_v36, %v206_v33  ;;  %v306_v42 = vadd.f32 %v287_v37, %v207_v34  ;;  %v291_v43 = vrot.slane %v259_v38, %v262_v8 }
  0x68   : > { %309 = vst [vmem:[%s198_s20 + $0x8] sm:$0xff] %v301_v30  ;;  %310 = vst [vmem:[%s198_s20 + $0x10] sm:$0xff] %v302_v31  ;;  %v303_v39 = vadd.f32 %v275_v32, %v204_v26 }
  0x69   : > { %313 = vst [vmem:[%s198_s20 + $0x28] sm:$0xff] %v305_v41  ;;  %314 = vst [vmem:[%s198_s20 + $0x30] sm:$0xff] %v306_v42  ;;  %v307_v44 = vadd.f32 %v291_v43, %v208_v40 }
  0x6a   : > { %311 = vst [vmem:[%s198_s20 + $0x18] sm:$0xff] %v303_v39 }
  0x6b   : > { %315 = vst [vmem:[%s198_s20 + $0x38] sm:$0xff] %v307_v44 }
  0x6c   : > { %575 = shalt.err (!%p572_p7)
}
  0x6d   : > { %s576_s29 = scalar_lea.hbm %s830_s13, 1024  ;;  %s580_s16 = scalar_lea.hbm %s875_s2, 4096 }
  0x6e   : > { %p577_p11 = scmp.ne.s32.totalorder %s830_s13, %s576_s29  ;;  %p581_p13 = scmp.lt.u32.totalorder %s830_s13, %s875_s2 }
  0x6f   : > { %p582_p9 = scmp.lt.u32.totalorder %s580_s16, %s576_s29  ;;  %p584_p12 = scmp.lt.u32.totalorder %s576_s29, %s830_s13 }
  0x70   : > { %p578_p8 = pnand %p577_p11, %p886_p0 }
  0x71   : > { %p583_p6 = por %p582_p9, %p581_p13 }
  0x72   : > { %p579_p1 = pneg %p578_p8 }
  0x73   : > { %p585_p10 = por %p584_p12, %p583_p6 }
  0x75   : > { %p586_p3 = pnand %p585_p10, %p579_p1 }
  0x77   : > { %589 = shalt.err (!%p586_p3)
}
  0x78   : > { %s640_s5 = smov 128   ;;  %s641_s8 = smov 8  }
  0x79   : > { %449 = dma.vmem_to_hbm [thread:$0]  (%p886_p0), %s825_s17, 1024, %s830_s13, %s317_s24, %s640_s5, %s640_s5, %s641_s8  }
  0x7a PF: > { %p463_p4 = scmp.ge.s32.totalorder %s632_s12, 2  ;;  %s345_s20 = sand.u32 1, %s620_s9  }
  0x7b   : > { %p887_p5 = scmp.ne.s32.totalorder %s881_s22, 0  ;;  %s346_s28 = scalar_lea.sflag [#allocation4], %s345_s20 }
  0x7d   : > { %p459_p2 = pnand %p463_p4, %p887_p5 }
  0x7f   : > { %615 = dma.done.wait (!%p459_p2), %s346_s28, 1024  }
  0x80   : > { %617 = vsyncadd (!%p459_p2), %s346_s28, 4294966272  ;;  %p18_p7 = scmp.ge.s32.totalorder %s682_s15, 6   ;;  %s888_s9 = smov %s624_s10 }
  0x81   : > { %s889_s10 = smov %s628_s11  ;;  %s890_s11 = smov %s694_s18 }
  0x82   : > { %s891_s12 = smov %s682_s15  ;;  %20 = sbr.rel (!%p18_p7) target bundleno = 7 (0x7), region = 86 }
  0x89   :  { %351 = vsyncpa [#allocation3], 1 }
  0x8a   :  { %353 = vsyncpa [#allocation3 + $0x1], 1 }
  0x8b   :  { %354 = vsyncpa [#allocation6], 1 }
  0x8c   :  { %356 = vsyncpa [#allocation6 + $0x1], 1 }
  0x8d   :  { %357 = vsyncpa [#allocation4], 1 }
  0x8e   :  { %359 = vsyncpa [#allocation4 + $0x1], 1 }

</bundles_post_ra>
